<compile_context>
chip_gen: v7x
topology: tpu7x:2x2x1
jax: 0.10.0
libtpu: 0.0.40
codegen_flags: <defaults>
</compile_context>

<pallas_src>
import functools

import jax
import jax.numpy as jnp
from jax.experimental import pallas as pl
from jax.experimental.pallas import tpu as pltpu

LN_EPS = 1e-5


def comparison_kernel(a_aug_ref, bT_ref, negbw4_ref, w3t_ref, sel_ref, expand_ref,
                      out_ref, m_scr, *, C, O):
    # Grid is (b, j, i) with i innermost.
    #   a_aug_ref : (1, ti, Kaug)   rows  [a | a@w4+b3 | 1]          (changes per i)
    #   bT_ref    : (1, C, tj)      b^T for this column tile         (changes per j)
    #   negbw4_ref: (1, 1, tj*O)    -(b@w4) flattened for this tile  (changes per j)
    #   w3t_ref   : (C, tj*O)       w3 tiled along lanes             (resident)
    #   sel_ref   : (O, tj*O)       Sel[o', j*O+o] = (o == o')       (resident)
    #   expand_ref: (tj, tj*O)      E[j', j*O+o]  = (j == j')        (resident)
    #   out_ref   : (1, ti, tj*O)
    #   m_scr     : (Kaug, tj*O)    cached M_aug (rebuilt when i == 0)
    i = pl.program_id(2)

    @pl.when(i == 0)
    def _build_m_aug():
        # b_rep[c, j*O+o] = b[col_j, c]  via a 0/1 MXU matmul (no relayouts).
        b_rep = jnp.dot(bT_ref[0], expand_ref[...],
                        preferred_element_type=jnp.float32)          # (C, tj*O)
        m_scr[0:C, :] = (b_rep * w3t_ref[...]).astype(m_scr.dtype)   # product path
        m_scr[C:C + O, :] = sel_ref[...]                             # + (a@w4 + b3)
        m_scr[C + O:, :] = negbw4_ref[0]                             # - (b@w4)

    # Hot loop: one wide-N MXU matmul (K = C+O+1, padded for free) + one store.
    out_ref[0] = jnp.dot(a_aug_ref[0], m_scr[...],
                         preferred_element_type=jnp.float32).astype(out_ref.dtype)


def comparison_layer(x, params, *, ti=128, tj=256,
                     compute_dtype=jnp.float32, out_dtype=None):
    """x: (Length, Batch, input_dim). Returns (Batch, Length, Length, output_dim)."""
    xb = jnp.transpose(x, (1, 0, 2)).astype(jnp.float32)             # (B, S, D)
    B, S, D = xb.shape
    C = params["w1"].shape[1]
    O = params["w3"].shape[1]
    out_dtype = x.dtype if out_dtype is None else out_dtype

    ti = min(ti, S)
    tj = min(tj, S)
    # TODO(synk): pad / mask edge tiles for sequence lengths not divisible by the tile.
    assert S % ti == 0 and S % tj == 0, "sequence length must divide the tiles"
    assert tj == S or (tj * O) % 128 == 0, "tj*O must be lane-aligned (128)"
    Kaug = C + O + 1

    # ---------- O(S)-cost preprocessing hoisted into XLA (review item) ----------
    mean = jnp.mean(xb, axis=-1, keepdims=True)
    var = jnp.mean((xb - mean) ** 2, axis=-1, keepdims=True)
    xn = (xb - mean) * jax.lax.rsqrt(var + LN_EPS)
    xn = xn * params["gamma"][0] + params["beta"][0]                  # (B, S, D)

    w12 = jnp.concatenate([params["w1"], params["w2"]], axis=1)      # (D, 2C)
    b12 = jnp.concatenate([params["b1"], params["b2"]], axis=1)[0]   # (2C,)
    ab = xn @ w12 + b12                                              # (B, S, 2C)
    a_act = ab[..., :C]                                              # linear1(xn)
    b_act = ab[..., C:]                                              # linear2(xn)

    aw4b3 = a_act @ params["w4"] + params["b3"][0]                   # (B, S, O)
    bw4 = b_act @ params["w4"]                                       # (B, S, O)

    a_aug = jnp.concatenate(
        [a_act, aw4b3, jnp.ones((B, S, 1), jnp.float32)], axis=-1
    ).astype(compute_dtype)                                          # (B, S, Kaug)
    bT = jnp.transpose(b_act, (0, 2, 1)).astype(compute_dtype)       # (B, C, S)
    neg_bw4_flat = (-bw4).reshape(B, 1, S * O).astype(compute_dtype)  # (B, 1, S*O)

    # Small, data-independent helper matrices (resident in VMEM).
    w3_tiled = jnp.tile(params["w3"].astype(compute_dtype), (1, tj))          # (C, tj*O)
    sel = jnp.tile(jnp.eye(O, dtype=compute_dtype), (1, tj))                  # (O, tj*O)
    expand = jnp.repeat(jnp.eye(tj, dtype=compute_dtype), O, axis=1)          # (tj, tj*O)

    kernel = functools.partial(comparison_kernel, C=C, O=O)

    out_flat = pl.pallas_call(
        kernel,
        out_shape=jax.ShapeDtypeStruct((B, S, S * O), out_dtype),
        grid_spec=pltpu.PrefetchScalarGridSpec(
            num_scalar_prefetch=0,
            grid=(B, S // tj, S // ti),                               # (b, j, i)
            in_specs=[
                pl.BlockSpec((1, ti, Kaug), lambda b, j, i: (b, i, 0)),   # A_aug rows
                pl.BlockSpec((1, C, tj), lambda b, j, i: (b, 0, j)),      # b^T cols
                pl.BlockSpec((1, 1, tj * O), lambda b, j, i: (b, 0, j)),  # -(b@w4) flat
                pl.BlockSpec((C, tj * O), lambda b, j, i: (0, 0)),        # w3 tiled
                pl.BlockSpec((O, tj * O), lambda b, j, i: (0, 0)),        # Sel
                pl.BlockSpec((tj, tj * O), lambda b, j, i: (0, 0)),       # expansion E
            ],
            out_specs=pl.BlockSpec((1, ti, tj * O), lambda b, j, i: (b, i, j)),
            scratch_shapes=[pltpu.VMEM((Kaug, tj * O), compute_dtype)],
        ),
        compiler_params=pltpu.CompilerParams(
            # i must stay "arbitrary" (M_aug cache is rebuilt at i == 0);
            # b and j shard across TensorCores.
            dimension_semantics=("parallel", "parallel", "arbitrary"),
            vmem_limit_bytes=64 * 1024 * 1024),
    )(a_aug, bT, neg_bw4_flat, w3_tiled, sel, expand)

    # Free row-major reshape (no data movement) -> module output layout.
    return out_flat.reshape(B, S, S, O)


def comparison_layer_ref(x, params):
    """Pure-JAX reference mirroring the PyTorch forward exactly."""
    xb = jnp.transpose(x, (1, 0, 2))
    mean = jnp.mean(xb, axis=-1, keepdims=True)
    var = jnp.mean((xb - mean) ** 2, axis=-1, keepdims=True)
    xn = (xb - mean) / jnp.sqrt(var + LN_EPS)
    xn = xn * params["gamma"][0] + params["beta"][0]
    a = xn @ params["w1"] + params["b1"][0]
    b = xn @ params["w2"] + params["b2"][0]
    prod = a[:, :, None, :] * b[:, None, :, :]
    diff = a[:, :, None, :] - b[:, None, :, :]
    return prod @ params["w3"] + params["b3"][0] + diff @ params["w4"]


def make_params(key, input_dim, output_dim, channel_dim):
    ks = jax.random.split(key, 8)
    scale = 0.1
    return {
        "gamma": jnp.ones((1, input_dim), jnp.float32),
        "beta": jnp.zeros((1, input_dim), jnp.float32),
        "w1": scale * jax.random.normal(ks[0], (input_dim, channel_dim), jnp.float32),
        "b1": scale * jax.random.normal(ks[1], (1, channel_dim), jnp.float32),
        "w2": scale * jax.random.normal(ks[2], (input_dim, channel_dim), jnp.float32),
        "b2": scale * jax.random.normal(ks[3], (1, channel_dim), jnp.float32),
        # Original module zero-inits linear3/linear4; random here for a nontrivial test.
        "w3": scale * jax.random.normal(ks[4], (channel_dim, output_dim), jnp.float32),
        "b3": scale * jax.random.normal(ks[5], (1, output_dim), jnp.float32),
        "w4": scale * jax.random.normal(ks[6], (channel_dim, output_dim), jnp.float32),
    }


if __name__ == "__main__":
    key = jax.random.PRNGKey(0)
    k_x, k_p, k_x2 = jax.random.split(key, 3)

    # ---- small shapes (single full-extent tile) ----
    LENGTH, BATCH, INPUT_DIM = 8, 2, 32
    CHANNEL_DIM, OUTPUT_DIM = 64, 16

    x = jax.random.normal(k_x, (LENGTH, BATCH, INPUT_DIM), jnp.float32)
    params = make_params(k_p, INPUT_DIM, OUTPUT_DIM, CHANNEL_DIM)
    ref = comparison_layer_ref(x, params)

    out = jax.block_until_ready(comparison_layer(x, params))
    assert out.shape == (BATCH, LENGTH, LENGTH, OUTPUT_DIM), out.shape
    assert jnp.allclose(out, ref, atol=1e-4, rtol=1e-4), \
        float(jnp.max(jnp.abs(out - ref)))

    # bf16-matmul path (v6e/v7x MXU rate; f32 accumulation) — loose tolerance.
    out_bf16 = jax.block_until_ready(
        comparison_layer(x, params, compute_dtype=jnp.bfloat16))
    assert jnp.allclose(out_bf16, ref, atol=5e-2, rtol=5e-2), \
        float(jnp.max(jnp.abs(out_bf16 - ref)))

    # ---- medium shape exercising the tiled path (multiple i and j tiles,
    # ---- per-j M_aug rebuild + revisit-skip of the j-indexed inputs) ----
    LENGTH2 = 256
    x2 = jax.random.normal(k_x2, (LENGTH2, BATCH, INPUT_DIM), jnp.float32)
    ref2 = comparison_layer_ref(x2, params)
    out2 = jax.block_until_ready(comparison_layer(x2, params, ti=128, tj=128))
    assert out2.shape == (BATCH, LENGTH2, LENGTH2, OUTPUT_DIM), out2.shape
    assert jnp.allclose(out2, ref2, atol=1e-4, rtol=1e-4), \
        float(jnp.max(jnp.abs(out2 - ref2)))

    print("KERNEL_OK")
</pallas_src>

<mosaic_0001>
module attributes {stable_mosaic.version = 11 : i64} {
  func.func @comparison_kernel(%arg0: i32, %arg1: i32, %arg2: i32, %arg3: memref<1x8x81xf32, #tpu.memory_space<vmem>>, %arg4: memref<1x64x8xf32, #tpu.memory_space<vmem>>, %arg5: memref<1x1x128xf32, #tpu.memory_space<vmem>>, %arg6: memref<64x128xf32, #tpu.memory_space<vmem>>, %arg7: memref<16x128xf32, #tpu.memory_space<vmem>>, %arg8: memref<8x128xf32, #tpu.memory_space<vmem>>, %arg9: memref<1x8x128xf32, #tpu.memory_space<vmem>>, %arg10: memref<81x128xf32, #tpu.memory_space<vmem>>) attributes {dimension_semantics = [#tpu.dimension_semantics<parallel>, #tpu.dimension_semantics<parallel>, #tpu.dimension_semantics<arbitrary>], iteration_bounds = array<i64: 2, 1, 1>, scalar_prefetch = 0 : i64, scratch_operands = 1 : i64, tpu.core_type = #tpu.core_type<tc>, window_params = [{transform_indices = @transform_0, window_bounds = array<i64: 1, 8, 81>}, {transform_indices = @transform_1, window_bounds = array<i64: 1, 64, 8>}, {transform_indices = @transform_2, window_bounds = array<i64: 1, 1, 128>}, {pipeline_mode = #tpu.pipeline_mode<synchronous>, transform_indices = @transform_3, window_bounds = array<i64: 64, 128>}, {pipeline_mode = #tpu.pipeline_mode<synchronous>, transform_indices = @transform_4, window_bounds = array<i64: 16, 128>}, {pipeline_mode = #tpu.pipeline_mode<synchronous>, transform_indices = @transform_5, window_bounds = array<i64: 8, 128>}, {transform_indices = @transform_6, window_bounds = array<i64: 1, 8, 128>}]} {
    %c0_i32 = arith.constant 0 : i32
    %0 = arith.cmpi eq, %arg2, %c0_i32 : i32
    %1 = arith.extui %0 : i1 to i32
    %c0_i32_0 = arith.constant 0 : i32
    %2 = arith.cmpi ne, %1, %c0_i32_0 : i32
    scf.if %2 {
      %c0_8 = arith.constant 0 : index
      %c0_9 = arith.constant 0 : index
      %c0_10 = arith.constant 0 : index
      %10 = vector.load %arg4[%c0_8, %c0_9, %c0_10] : memref<1x64x8xf32, #tpu.memory_space<vmem>>, vector<1x64x8xf32>
      %11 = vector.shape_cast %10 : vector<1x64x8xf32> to vector<64x8xf32>
      %c0_11 = arith.constant 0 : index
      %c0_12 = arith.constant 0 : index
      %12 = vector.load %arg8[%c0_11, %c0_12] : memref<8x128xf32, #tpu.memory_space<vmem>>, vector<8x128xf32>
      %cst_13 = arith.constant dense<0.000000e+00> : vector<64x128xf32>
      %13 = tpu.matmul %11, %12, %cst_13 {dimension_numbers = #tpu.dot_dimension_numbers<[1], [0], [0], [1], [0, 0, 1, 1], [], []>} : vector<64x8xf32>, vector<8x128xf32>, vector<64x128xf32> -> vector<64x128xf32>
      %c0_14 = arith.constant 0 : index
      %c0_15 = arith.constant 0 : index
      %14 = vector.load %arg6[%c0_14, %c0_15] : memref<64x128xf32, #tpu.memory_space<vmem>>, vector<64x128xf32>
      %15 = arith.mulf %13, %14 : vector<64x128xf32>
      %c0_16 = arith.constant 0 : index
      %c0_17 = arith.constant 0 : index
      %16 = vector.load %arg10[%c0_16, %c0_17] : memref<81x128xf32, #tpu.memory_space<vmem>>, vector<64x128xf32>
      tpu.vector_store %arg10[%c0_16, %c0_17], %15 {strides = array<i32>} : memref<81x128xf32, #tpu.memory_space<vmem>>, vector<64x128xf32>,
      %c0_18 = arith.constant 0 : index
      %c0_19 = arith.constant 0 : index
      %17 = vector.load %arg7[%c0_18, %c0_19] : memref<16x128xf32, #tpu.memory_space<vmem>>, vector<16x128xf32>
      %c64 = arith.constant 64 : index
      %c0_20 = arith.constant 0 : index
      %18 = vector.load %arg10[%c64, %c0_20] : memref<81x128xf32, #tpu.memory_space<vmem>>, vector<16x128xf32>
      tpu.vector_store %arg10[%c64, %c0_20], %17 {strides = array<i32>} : memref<81x128xf32, #tpu.memory_space<vmem>>, vector<16x128xf32>,
      %c0_21 = arith.constant 0 : index
      %c0_22 = arith.constant 0 : index
      %c0_23 = arith.constant 0 : index
      %19 = vector.load %arg5[%c0_21, %c0_22, %c0_23] : memref<1x1x128xf32, #tpu.memory_space<vmem>>, vector<1x1x128xf32>
      %20 = vector.shape_cast %19 : vector<1x1x128xf32> to vector<1x128xf32>
      %c80 = arith.constant 80 : index
      %c0_24 = arith.constant 0 : index
      %21 = vector.load %arg10[%c80, %c0_24] : memref<81x128xf32, #tpu.memory_space<vmem>>, vector<1x128xf32>
      tpu.vector_store %arg10[%c80, %c0_24], %20 {strides = array<i32>} : memref<81x128xf32, #tpu.memory_space<vmem>>, vector<1x128xf32>,
    } else {
    }
    %c0 = arith.constant 0 : index
    %c0_1 = arith.constant 0 : index
    %c0_2 = arith.constant 0 : index
    %3 = vector.load %arg3[%c0, %c0_1, %c0_2] : memref<1x8x81xf32, #tpu.memory_space<vmem>>, vector<1x8x81xf32>
    %4 = vector.shape_cast %3 : vector<1x8x81xf32> to vector<8x81xf32>
    %c0_3 = arith.constant 0 : index
    %c0_4 = arith.constant 0 : index
    %5 = vector.load %arg10[%c0_3, %c0_4] : memref<81x128xf32, #tpu.memory_space<vmem>>, vector<81x128xf32>
    %cst = arith.constant dense<0.000000e+00> : vector<8x128xf32>
    %6 = tpu.matmul %4, %5, %cst {dimension_numbers = #tpu.dot_dimension_numbers<[1], [0], [0], [1], [0, 0, 1, 1], [], []>} : vector<8x81xf32>, vector<81x128xf32>, vector<8x128xf32> -> vector<8x128xf32>
    %c0_5 = arith.constant 0 : index
    %c0_6 = arith.constant 0 : index
    %c0_7 = arith.constant 0 : index
    %7 = vector.load %arg9[%c0_5, %c0_6, %c0_7] : memref<1x8x128xf32, #tpu.memory_space<vmem>>, vector<1x8x128xf32>
    %8 = vector.shape_cast %7 : vector<1x8x128xf32> to vector<8x128xf32>
    %9 = vector.shape_cast %6 : vector<8x128xf32> to vector<1x8x128xf32>
    tpu.vector_store %arg9[%c0_5, %c0_6, %c0_7], %9 {strides = array<i32>} : memref<1x8x128xf32, #tpu.memory_space<vmem>>, vector<1x8x128xf32>,
    return
  }
  func.func @transform_0(%arg0: i32, %arg1: i32, %arg2: i32) -> (i32, i32, i32) {
    %c0_i32 = arith.constant 0 : i32
    %c0_i32_0 = arith.constant 0 : i32
    return %arg0, %arg2, %c0_i32 : i32, i32, i32
  }
  func.func @transform_1(%arg0: i32, %arg1: i32, %arg2: i32) -> (i32, i32, i32) {
    %c0_i32 = arith.constant 0 : i32
    %c0_i32_0 = arith.constant 0 : i32
    return %arg0, %c0_i32, %arg1 : i32, i32, i32
  }
  func.func @transform_2(%arg0: i32, %arg1: i32, %arg2: i32) -> (i32, i32, i32) {
    %c0_i32 = arith.constant 0 : i32
    %c0_i32_0 = arith.constant 0 : i32
    return %arg0, %c0_i32, %arg1 : i32, i32, i32
  }
  func.func @transform_3(%arg0: i32, %arg1: i32, %arg2: i32) -> (i32, i32) {
    %c0_i32 = arith.constant 0 : i32
    %c0_i32_0 = arith.constant 0 : i32
    %c0_i32_1 = arith.constant 0 : i32
    return %c0_i32, %c0_i32_0 : i32, i32
  }
  func.func @transform_4(%arg0: i32, %arg1: i32, %arg2: i32) -> (i32, i32) {
    %c0_i32 = arith.constant 0 : i32
    %c0_i32_0 = arith.constant 0 : i32
    %c0_i32_1 = arith.constant 0 : i32
    return %c0_i32, %c0_i32_0 : i32, i32
  }
  func.func @transform_5(%arg0: i32, %arg1: i32, %arg2: i32) -> (i32, i32) {
    %c0_i32 = arith.constant 0 : i32
    %c0_i32_0 = arith.constant 0 : i32
    %c0_i32_1 = arith.constant 0 : i32
    return %c0_i32, %c0_i32_0 : i32, i32
  }
  func.func @transform_6(%arg0: i32, %arg1: i32, %arg2: i32) -> (i32, i32, i32) {
    %c0_i32 = arith.constant 0 : i32
    return %arg0, %arg2, %arg1 : i32, i32, i32
  }
}

</mosaic_0001>

<bundles_post_ra>
// kernel: tpu_custom_call.1
= control target key start
LH: loop header
LB: loop body
LE: loop exit
PB: predicated region body
PF: predicated region fallthrough
CT: control target
= control target key end

     0   :  { %s1742_s0 = inlined_call_operand.hbm [shape: f32[2,8,81], index: 0, kind: input, shape index: {}]   ;;  %s1743_s1 = inlined_call_operand.hbm [shape: f32[2,64,8], index: 1, kind: input, shape index: {}]   ;;  %s1744_s2 = inlined_call_operand.hbm [shape: f32[2,1,128], index: 2, kind: input, shape index: {}]   ;;  %s1745_s3 = inlined_call_operand.hbm [shape: f32[64,128], index: 3, kind: input, shape index: {}]   ;;  %s1746_s4 = inlined_call_operand.hbm [shape: f32[16,128], index: 4, kind: input, shape index: {}]   ;;  %s1747_s5 = inlined_call_operand.hbm [shape: f32[8,128], index: 5, kind: input, shape index: {}]   ;;  %s1748_s6 = inlined_call_operand.hbm [shape: f32[2,8,128], index: 6, kind: output, shape index: {}]  }
   0x1   :  { %1771 = sst [smem:[#allocation26_spill]] %s1743_s1 }
   0x2   :  { %1772 = sst [smem:[#allocation27_spill]] %s1745_s3 }
   0x3   :  { %1773 = sst [smem:[#allocation28_spill]] %s1748_s6 }
   0x4   :  { %11 = vsyncpa [#allocation4], 0 }
   0x5   :  { %13 = vsyncpa [#allocation4 + $0x1], 0 }
   0x6   :  { %14 = vsyncpa [#allocation7], 0 }
   0x7   :  { %16 = vsyncpa [#allocation7 + $0x1], 0 }
   0x8   :  { %17 = vsyncpa [#allocation10], 0 }
   0x9   :  { %18 = vsyncpa [#allocation13], 0 }
   0xa   :  { %19 = vsyncpa [#allocation5], 0 }
   0xb   :  { %21 = vsyncpa [#allocation5 + $0x1], 0  ;;  %s1383_s21 = smov 0   ;;  %s1385_s22 = smov 0  }
   0xc   :  { %s1387_s23 = smov 0   ;;  %s1389_s24 = smov 0  }
   0xd   :  { %s1391_s25 = smov 0   ;;  %s1393_s26 = smov 0  }
   0xe LB: > { %1774 = sst [smem:[#allocation20_spill]] %s1314_s21  ;;  %s1414_s27 = sadd.s32 4294967295, %s1334_s26   ;;  %s1334_s26 = sphi %s1393_s26, %s27_s26   ;;  %s1330_s25 = sphi %s1391_s25, %s1821_s25   ;;  %s1326_s24 = sphi %s1389_s24, %s1820_s24   ;;  %s1322_s23 = sphi %s1387_s23, %s1819_s23   ;;  %s1318_s22 = sphi %s1385_s22, %s1818_s22   ;;  %s1314_s21 = sphi %s1383_s21, %s1817_s21  }
   0xf   : > { %1775 = sst [smem:[#allocation21_spill]] %s1326_s24  ;;  %s849_s28 = sadd.s32 4294967294, %s1334_s26  }
  0x10   : > { %p62_p0 = scmp.ne.s32.totalorder %s1322_s23, %s1318_s22  ;;  %p63_p1 = scmp.eq.s32.totalorder %s1334_s26, 0 }
  0x11   : > { %p68_p2 = scmp.ne.s32.totalorder %s1318_s22, %s1314_s21  ;;  %p1750_p3 = scmp.eq.s32.totalorder %s1414_s27, 0 }
  0x12   : > { %p215_p4 = scmp.eq.s32.totalorder %s1414_s27, 1  ;;  %p1425_p5 = por %p63_p1, %p62_p0 }
  0x13   : > { %p221_p6 = scmp.eq.s32.totalorder %s849_s28, 1  ;;  %p1431_p7 = por %p1750_p3, %p68_p2 }
  0x14   : > { %p1435_p8 = por %p215_p4, %p62_p0  ;;  %p850_p10 = scmp.ge.s32.totalorder %s1334_s26, 1 }
  0x15   : > { %s1777_s7 = scalar_select %p1431_p7, 1, 0 }
  0x16   : > { %s1778_s8 = scalar_select %p1435_p8, 1, 0 }
  0x17   : > { %p1439_p9 = por %p221_p6, %p68_p2  ;;  %p228_p11 = scmp.lt.s32.totalorder %s1334_s26, 3 }
  0x18   : > { %1779 = sst [smem:[#allocation22_spill]] %s1778_s8  ;;  %s1336_s11 = smov [#allocation9]  }
  0x19   : > { %s1780_s9 = scalar_select %p1439_p9, 1, 0 }
  0x1a   : > { %p1445_p12 = pnand %p850_p10, %p228_p11  ;;  %s240_s12 = sshll.u32 %s1336_s11, 4  ;;  %s1449_s12 = int_to_ptr.vmem [resolvable:$true] %s240_s12 }
  0x1b   : > { %1781 = sst [smem:[#allocation23_spill]] %s1780_s9  ;;  %s46_s14 = sadd.s32 1, %s1330_s25 }
  0x1c   : > { %s1782_s10 = scalar_select %p1445_p12, 1, 0 }
  0x1d   : > { %p978_p13 = pneg %p1445_p12  ;;  %s1463_s15 = sand.u32 1, %s1322_s23  }
  0x1e   : > { %p1465_p4 = scmp.ge.s32.totalorder %s46_s14, 2  ;;  %s1785_s3 = sld [smem:[#allocation27_spill]] }
  0x1f   : > { %p1457_p2 = pnand %p978_p13, %p1750_p3 }
  0x21   : > { %s1783_s13 = scalar_select %p1457_p2, 1, 0 }
  0x22   : > { %p1477_p10 = pneg %p1457_p2 }
  0x24   : > { %s1066_s19 = scalar_lea.hbm %s1785_s3, 1024 }
  0x25   : > { %p1067_p6 = scmp.ne.s32.totalorder %s1785_s3, %s1066_s19  ;;  %p1073_p0 = scmp.lt.u32.totalorder %s1066_s19, %s1785_s3 }
  0x26   : > { %s1786_s11 = scalar_select %p1477_p10, 1, 0 }
  0x27   : > { %p1069_p11 = pnand %p1477_p10, %p1067_p6 }
  0x29   : > { %p1070_p13 = pneg %p1069_p11 }
  0x2b   : > { %p1075_p3 = pnand %p1073_p0, %p1070_p13 }
  0x2d   : > { %1078 = shalt.err (!%p1075_p3)
}
  0x2e   : > { %s1079_s17 = scalar_lea.vmem %s1449_s12, 1024  ;;  %p1087_p7 = scmp.lt.s32.totalorder %s1449_s12, %s1449_s12 }
  0x2f   : > { %p1080_p1 = scmp.ne.s32.totalorder %s1449_s12, %s1079_s17  ;;  %p1088_p12 = scmp.lt.s32.totalorder %s1079_s17, %s1079_s17 }
  0x31   : > { %p1082_p9 = pnand %p1080_p1, %p1477_p10  ;;  %p1089_p6 = por %p1088_p12, %p1087_p7 }
  0x33   : > { %p1083_p8 = pneg %p1082_p9 }
  0x35   : > { %p1090_p11 = pnand %p1089_p6, %p1083_p8 }
  0x37   : > { %1093 = shalt.err (!%p1090_p11)
}
  0x38   : > { %s1758_s18 = smov 128   ;;  %s1760_s29 = smov 8  }
  0x39   : > { %981 = dma.hbm_to_vmem [thread:$0]  (!%p1457_p2), %s1785_s3, 1024, %s1449_s12, [#allocation10], %s1758_s18, %s1758_s18, %s1760_s29  }
  0x3a   : > { %s1823_s14 = smov (%p1465_p4, %s46_s14), 0  ;;  %p1788_p3 = scmp.lt.s32.totalorder %s1334_s26, 2 }
  0x3b   : > { %1787 = sst [smem:[#allocation24_spill]] %s1823_s14  ;;  %s297_s28 = sand.u32 1, %s1334_s26  }
  0x3c   : > { %p1509_p7 = pnand %p1788_p3, %p1425_p5  ;;  %s50_s17 = ssub.s32 %s1330_s25, %s1823_s14 }
  0x3d   : > { %p53_p8 = scmp.eq.s32.totalorder %s50_s17, 0  ;;  %s857_s21 = sshll.u32 %s1463_s15, 6 }
  0x3e   : > { %s1789_s20 = scalar_select %p1509_p7, 1, 0 }
  0x3f   : > { %s882_s6 = sshll.u32 %s1330_s25, 10  ;;  %s1790_s8 = sadd.s32 1, %s1322_s23 }
  0x40   : > { %s1521_s24 = scalar_select %p53_p8, %s1322_s23, %s1790_s8  }
  0x41   : > { %s1792_s1 = sld [smem:[#allocation26_spill]]  ;;  %s301_s30 = scalar_lea.vmem [#allocation6], %s857_s21 }
  0x42   : > { %1791 = sst [smem:[#allocation25_spill]] %s1521_s24  ;;  %s309_s19 = sshll.u32 %s301_s30, 4  ;;  %s1528_s19 = int_to_ptr.vmem [resolvable:$true] %s309_s19 }
  0x43   : > { %s1339_s18 = smov [#allocation11]   ;;  %s1532_s29 = scalar_lea.sflag [#allocation7], %s297_s28 }
  0x44   : > { %s1530_s17 = sshll.u32 %s1339_s18, 4  ;;  %p1538_p9 = pneg %p1509_p7  ;;  %s254_s17 = int_to_ptr.vmem [resolvable:$true] %s1530_s17 }
  0x46   : > { %s1793_s12 = scalar_select %p1538_p9, 1, 0 }
  0x47   : > { %s1526_s9 = scalar_lea.hbm %s1792_s1, %s882_s6  ;;  %s1099_s16 = scalar_lea.hbm %s1792_s1, 2048 }
  0x48   : > { %s1094_s8 = scalar_lea.hbm %s1526_s9, 1024  ;;  %p1100_p1 = scmp.lt.u32.totalorder %s1526_s9, %s1792_s1 }
  0x49   : > { %p1095_p5 = scmp.ne.s32.totalorder %s1526_s9, %s1094_s8  ;;  %p1101_p4 = scmp.lt.u32.totalorder %s1099_s16, %s1094_s8 }
  0x4a   : > { %p1103_p6 = scmp.lt.u32.totalorder %s1094_s8, %s1526_s9 }
  0x4b   : > { %p1097_p12 = pnand %p1538_p9, %p1095_p5  ;;  %p1102_p13 = por %p1101_p4, %p1100_p1 }
  0x4d   : > { %p1098_p0 = pneg %p1097_p12  ;;  %p1104_p11 = por %p1103_p6, %p1102_p13 }
  0x4f   : > { %p1105_p3 = pnand %p1104_p11, %p1098_p0 }
  0x51   : > { %1108 = shalt.err (!%p1105_p3)
}
  0x52   : > { %s1109_s28 = scalar_lea.vmem %s1528_s19, 1024  ;;  %s1340_s6 = smov [#allocation6]  }
  0x53   : > { %p1110_p8 = scmp.ne.s32.totalorder %s1528_s19, %s1109_s28  ;;  %s1114_s21 = sshll.u32 %s1340_s6, 4  ;;  %s1115_s21 = int_to_ptr.vmem [resolvable:$false] %s1114_s21 }
  0x54   : > { %s1116_s30 = scalar_lea.vmem %s1115_s21, 2048  ;;  %p1117_p2 = scmp.lt.s32.totalorder %s1528_s19, %s1115_s21 }
  0x55   : > { %p1112_p5 = pnand %p1110_p8, %p1538_p9  ;;  %p1118_p10 = scmp.lt.s32.totalorder %s1116_s30, %s1109_s28 }
  0x57   : > { %p1113_p12 = pneg %p1112_p5  ;;  %p1119_p1 = por %p1118_p10, %p1117_p2 }
  0x59   : > { %p1120_p4 = pnand %p1119_p1, %p1113_p12 }
  0x5b   : > { %1123 = shalt.err (!%p1120_p4)
}
  0x5c   : > { %s1794_s8 = smov 8   ;;  %s1795_s16 = smov 128  }
  0x5d   : > { %994 = dma.hbm_to_vmem [thread:$0]  (!%p1509_p7), %s1526_s9, 1024, %s1528_s19, %s1532_s29, %s1795_s16, %s1795_s16, %s1794_s8  }
  0x5e   : > { %s1124_s21 = scalar_lea.hbm %s1746_s4, 256  ;;  %p1796_p10 = scmp.ne.s32.totalorder %s1786_s11, 0 }
  0x5f   : > { %p1125_p2 = scmp.ne.s32.totalorder %s1746_s4, %s1124_s21  ;;  %p1131_p6 = scmp.lt.u32.totalorder %s1124_s21, %s1746_s4 }
  0x61   : > { %p1127_p0 = pnand %p1125_p2, %p1796_p10 }
  0x63   : > { %p1128_p13 = pneg %p1127_p0 }
  0x65   : > { %p1133_p11 = pnand %p1131_p6, %p1128_p13 }
  0x67   : > { %1136 = shalt.err (!%p1133_p11)
}
  0x68   : > { %s1137_s14 = scalar_lea.vmem %s254_s17, 256  ;;  %p1145_p12 = scmp.lt.s32.totalorder %s254_s17, %s254_s17 }
  0x69   : > { %p1138_p3 = scmp.ne.s32.totalorder %s254_s17, %s1137_s14  ;;  %p1146_p1 = scmp.lt.s32.totalorder %s1137_s14, %s1137_s14 }
  0x6b   : > { %p1140_p8 = pnand %p1138_p3, %p1796_p10  ;;  %p1147_p4 = por %p1146_p1, %p1145_p12 }
  0x6d   : > { %p1141_p5 = pneg %p1140_p8 }
  0x6f   : > { %p1148_p7 = pnand %p1147_p4, %p1141_p5 }
  0x71   : > { %1151 = shalt.err (!%p1148_p7)
}
  0x72   : > { %p1797_p2 = scmp.ne.s32.totalorder %s1783_s13, 0  ;;  %s1341_s9 = smov [#allocation12]  }
  0x73   : > { %s267_s19 = sshll.u32 %s1341_s9, 4  ;;  %s855_s18 = sshll.u32 %s1463_s15, 3  ;;  %s268_s19 = int_to_ptr.vmem [resolvable:$true] %s267_s19 }
  0x74   : > { %984 = dma.hbm_to_vmem [thread:$0]  (!%p1797_p2), %s1746_s4, 256, %s254_s17, [#allocation10], %s1795_s16, %s1795_s16, %s1794_s8  }
  0x75   : > { %s1152_s21 = scalar_lea.hbm %s1747_s5, 128 }
  0x76   : > { %p1153_p7 = scmp.ne.s32.totalorder %s1747_s5, %s1152_s21  ;;  %p1159_p6 = scmp.lt.u32.totalorder %s1152_s21, %s1747_s5 }
  0x78   : > { %p1155_p0 = pnand %p1153_p7, %p1796_p10 }
  0x7a   : > { %p1156_p13 = pneg %p1155_p0 }
  0x7c   : > { %p1161_p11 = pnand %p1159_p6, %p1156_p13 }
  0x7e   : > { %1164 = shalt.err (!%p1161_p11)
}
  0x7f   : > { %s1165_s17 = scalar_lea.vmem %s268_s19, 128  ;;  %p1173_p12 = scmp.lt.s32.totalorder %s268_s19, %s268_s19 }
  0x80   : > { %p1166_p3 = scmp.ne.s32.totalorder %s268_s19, %s1165_s17  ;;  %p1174_p1 = scmp.lt.s32.totalorder %s1165_s17, %s1165_s17 }
  0x82   : > { %p1168_p8 = pnand %p1166_p3, %p1796_p10  ;;  %p1175_p4 = por %p1174_p1, %p1173_p12 }
  0x84   : > { %p1169_p5 = pneg %p1168_p8 }
  0x86   : > { %p1176_p9 = pnand %p1175_p4, %p1169_p5 }
  0x88   : > { %1179 = shalt.err (!%p1176_p9)
}
  0x89   : > { %987 = dma.hbm_to_vmem [thread:$0]  (!%p1797_p2), %s1747_s5, 128, %s268_s19, [#allocation13]  }
  0x8a   : > { %s856_s24 = sshll.u32 %s1330_s25, 7  ;;  %s282_s6 = scalar_lea.vmem [#allocation3], %s855_s18 }
  0x8b   : > { %s1610_s11 = scalar_lea.hbm %s1742_s0, %s856_s24  ;;  %s290_s14 = sshll.u32 %s282_s6, 4  ;;  %s291_s14 = int_to_ptr.vmem [resolvable:$true] %s290_s14 }
  0x8c   : > { %s279_s13 = scalar_lea.sflag [#allocation4], %s1463_s15  ;;  %s1180_s21 = scalar_lea.hbm %s1610_s11, 128 }
  0x8d   : > { %p1181_p9 = scmp.ne.s32.totalorder %s1610_s11, %s1180_s21  ;;  %p1798_p10 = scmp.ne.s32.totalorder %s1793_s12, 0 }
  0x8e   : > { %s1185_s30 = scalar_lea.hbm %s1742_s0, 256  ;;  %p1186_p2 = scmp.lt.u32.totalorder %s1610_s11, %s1742_s0 }
  0x8f   : > { %p1183_p7 = pnand %p1181_p9, %p1798_p10  ;;  %p1187_p13 = scmp.lt.u32.totalorder %s1185_s30, %s1180_s21 }
  0x90   : > { %p1189_p11 = scmp.lt.u32.totalorder %s1180_s21, %s1610_s11 }
  0x91   : > { %p1184_p0 = pneg %p1183_p7  ;;  %p1188_p6 = por %p1187_p13, %p1186_p2 }
  0x93   : > { %p1190_p3 = por %p1189_p11, %p1188_p6 }
  0x95   : > { %p1191_p8 = pnand %p1190_p3, %p1184_p0 }
  0x97   : > { %1194 = shalt.err (!%p1191_p8)
}
  0x98   : > { %s1195_s18 = scalar_lea.vmem %s291_s14, 128  ;;  %s1342_s8 = smov [#allocation3]  }
  0x99   : > { %p1196_p5 = scmp.ne.s32.totalorder %s291_s14, %s1195_s18  ;;  %s1200_s16 = sshll.u32 %s1342_s8, 4  ;;  %s1201_s16 = int_to_ptr.vmem [resolvable:$false] %s1200_s16 }
  0x9a   : > { %s1202_s24 = scalar_lea.vmem %s1201_s16, 256  ;;  %p1203_p4 = scmp.lt.s32.totalorder %s291_s14, %s1201_s16 }
  0x9b   : > { %p1198_p12 = pnand %p1196_p5, %p1798_p10  ;;  %p1204_p9 = scmp.lt.s32.totalorder %s1202_s24, %s1195_s18 }
  0x9d   : > { %p1199_p1 = pneg %p1198_p12  ;;  %p1205_p7 = por %p1204_p9, %p1203_p4 }
  0x9f   : > { %p1206_p2 = pnand %p1205_p7, %p1199_p1 }
  0xa1   : > { %1209 = shalt.err (!%p1206_p2)
}
  0xa2   : > { %p1799_p13 = scmp.ne.s32.totalorder %s1789_s20, 0  ;;  %s860_s3 = sshll.u32 %s1330_s25, 4 }
  0xa3   : > { %s322_s9 = scalar_lea.vmem [#allocation8], %s1463_s15  ;;  %s328_s28 = scalar_lea.hbm %s1744_s2, %s860_s3 }
  0xa4   : > { %991 = dma.hbm_to_vmem [thread:$0]  (!%p1799_p13), %s1610_s11, 128, %s291_s14, %s279_s13  }
  0xa5   : > { %s330_s6 = sshll.u32 %s322_s9, 4  ;;  %s1210_s30 = scalar_lea.hbm %s328_s28, 16  ;;  %s331_s6 = int_to_ptr.vmem [resolvable:$true] %s330_s6 }
  0xa6   : > { %p1211_p0 = scmp.ne.s32.totalorder %s328_s28, %s1210_s30  ;;  %s1215_s18 = scalar_lea.hbm %s1744_s2, 32 }
  0xa7   : > { %p1216_p3 = scmp.lt.u32.totalorder %s328_s28, %s1744_s2  ;;  %p1217_p8 = scmp.lt.u32.totalorder %s1215_s18, %s1210_s30 }
  0xa8   : > { %p1213_p6 = pnand %p1211_p0, %p1798_p10  ;;  %p1219_p12 = scmp.lt.u32.totalorder %s1210_s30, %s328_s28 }
  0xa9   : > { %p1218_p5 = por %p1217_p8, %p1216_p3 }
  0xaa   : > { %p1214_p11 = pneg %p1213_p6 }
  0xab   : > { %p1220_p1 = por %p1219_p12, %p1218_p5 }
  0xad   : > { %p1221_p4 = pnand %p1220_p1, %p1214_p11 }
  0xaf   : > { %1224 = shalt.err (!%p1221_p4)
}
  0xb0   : > { %s1225_s15 = scalar_lea.vmem %s331_s6, 16  ;;  %s1343_s11 = smov [#allocation8]  }
  0xb1   : > { %p1226_p9 = scmp.ne.s32.totalorder %s331_s6, %s1225_s15  ;;  %s1230_s14 = sshll.u32 %s1343_s11, 4  ;;  %s1231_s14 = int_to_ptr.vmem [resolvable:$false] %s1230_s14 }
  0xb2   : > { %s1232_s13 = scalar_lea.vmem %s1231_s14, 32  ;;  %p1233_p0 = scmp.lt.s32.totalorder %s331_s6, %s1231_s14 }
  0xb3   : > { %p1228_p7 = pnand %p1226_p9, %p1798_p10  ;;  %p1234_p6 = scmp.lt.s32.totalorder %s1232_s13, %s1225_s15 }
  0xb5   : > { %p1229_p2 = pneg %p1228_p7  ;;  %p1235_p13 = por %p1234_p6, %p1233_p0 }
  0xb7   : > { %p1236_p3 = pnand %p1235_p13, %p1229_p2 }
  0xb9   : > { %1239 = shalt.err (!%p1236_p3)
}
  0xba   : > { %p1800_p8 = scmp.ne.s32.totalorder %s1789_s20, 0  ;;  %p1801_p11 = scmp.ne.s32.totalorder %s1782_s10, 0 }
  0xbb   : > { %s1651_s12 = sand.u32 (!%p1801_p11), 1, %s1318_s22   ;;  %p1802_p10 = scmp.ne.s32.totalorder (!%p1801_p11), %s1777_s7, 0 }
  0xbc   : > { %997 = dma.hbm_to_vmem [thread:$0]  (!%p1800_p8), %s328_s28, 16, %s331_s6, %s1532_s29  }
  0xbd   : > { %339 = sbr.rel (%p1801_p11) target bundleno = 674 (0x2a2), region = 44  ;;  %s862_s24 = sshll.u32 (!%p1801_p11), %s1651_s12, 3 }
  0xbe   : > { %s342_s3 = scalar_lea.sflag (!%p1801_p11), [#allocation4], %s1651_s12  ;;  %s1657_s9 = scalar_lea.vmem (!%p1801_p11), [#allocation3], %s862_s24 }
  0xc4   : > { %1293 = dma.done.wait (%p1802_p10), %s342_s3, 128  }
  0xc5   : > { %1295 = vsyncadd (%p1802_p10), %s342_s3, 4294967168  ;;  %s350_s10 = sand.u32 1, %s1414_s27   ;;  %s863_s29 = sshll.u32 %s1651_s12, 6 }
  0xc6   : > { %s351_s20 = scalar_lea.sflag [#allocation7], %s350_s10  ;;  %s354_s6 = scalar_lea.vmem [#allocation6], %s863_s29 }
  0xc7   : > { %1297 = dma.done.wait (%p1802_p10), %s351_s20, 1040  }
  0xc8   : > { %1299 = vsyncadd (%p1802_p10), %s351_s20, 4294966256  ;;  %s362_s21 = scalar_lea.vmem [#allocation8], %s1651_s12  ;;  %p1803_p13 = scmp.eq.s32.totalorder %s1414_s27, 0 }
  0xca   : > { %1301 = dma.done.wait (%p1803_p13), [#allocation10], 1280   ;;  %p1804_p5 = pmov %p1803_p13 }
  0xcc   : > { %1303 = vsyncadd (%p1804_p5), [#allocation10], 4294966016  ;;  %p1805_p12 = pmov %p1804_p5 }
  0xcd   : > { %p1806_p1 = pmov %p1804_p5 }
  0xce   : > { %1305 = dma.done.wait (%p1805_p12), [#allocation13], 128  }
  0xcf   : > { %1307 = vsyncadd (%p1806_p1), [#allocation13], 4294967168  ;;  %vm425_vm0 = vcmask 64512   ;;  %v424_v0 = vld [vmem:[#allocation12] sm:$0xff]  ;;  %v416_v1 = vld [vmem:[%s354_s6] sm:$0xff]  ;;  %v1344_v9 = vmov 0.0|0.0  }
  0xd0   : > { %v417_v2 = vld [vmem:[%s354_s6 + $0x8] sm:$0xff]  ;;  %904 = vmatprep.subr.mxu0 %v424_v0  ;;  %906 = vmatprep.mubr.msk.f32.mxu0 %vm425_vm0, %v416_v1  ;;  %v418_v3 = vld [vmem:[%s354_s6 + $0x10] sm:$0xff]  ;;  %v419_v4 = vld [vmem:[%s354_s6 + $0x18] sm:$0xff]  ;;  %vm1345_vm1 = vmmov 0   ;;  %v1346_v14 = vmov 0.0   ;;  %s1807_s27 = sld [smem:[#allocation21_spill]] }
  0xd1   : > { %905 = vmatpush3.msra.mxu0 %v424_v0  ;;  %v420_v5 = vld [vmem:[%s354_s6 + $0x20] sm:$0xff]  ;;  %v421_v6 = vld [vmem:[%s354_s6 + $0x28] sm:$0xff]  ;;  %v422_v7 = vld [vmem:[%s354_s6 + $0x30] sm:$0xff]  ;;  %943 = vmatprep.subr.bf16.mxu1 %v1344_v9  ;;  %vm601_vm2 = vcmask 1040384   ;;  %s1808_s7 = sld [smem:[#allocation22_spill]]  ;;  %vm597_vm3 = vcmask 662528  }
  0xd2   : > { %907 = vmatmul.mubr.msk.f32.vlgmr.msra.gmra.mrb[0].mxu0 %vm425_vm0, %v417_v2  ;;  %v423_v8 = vld [vmem:[%s354_s6 + $0x38] sm:$0xff]  ;;  %v579_v11 = vld [vmem:[#allocation11] sm:$0xff]  ;;  %v580_v12 = vld [vmem:[#allocation11 + $0x8] sm:$0xff]  ;;  %940 = vmatprep.mubr.msk.f32.mxu1 %vm1345_vm1, %v1346_v14  ;;  %s411_s19 = scalar_lea.vmem [#allocation14], %s862_s24  ;;  %s1809_s18 = sld [smem:[#allocation28_spill]] }
  0xd3   : > { %909 = vmatprep.mubr.msk.f32.mxu0 %vm425_vm0, %v418_v3  ;;  %v583_v10 = vld [vmem:[%s362_s21] sm:$0x1]  ;;  %v956_v13 = vpack.c.bf16 %v580_v12, %v579_v11  ;;  %v556_v15 = vld [vmem:[#allocation9 + $0x8] sm:$0xff]  ;;  %v555_v16 = vld [vmem:[#allocation9] sm:$0xff]  ;;  %s692_s28 = sshll.u32 %s411_s19, 4  ;;  %s677_s16 = scalar_lea.sflag [#allocation5], %s1651_s12  ;;  %s1690_s28 = int_to_ptr.vmem [resolvable:$true] %s692_s28 }
  0xd4   : > { %584 = vst [vmem:[#allocation2 + $0x50] sm:$0x1] %v583_v10  ;;  %v558_v21 = vld [vmem:[#allocation9 + $0x18] sm:$0xff]  ;;  %v557_v22 = vld [vmem:[#allocation9 + $0x10] sm:$0xff]  ;;  %v560_v28 = vld [vmem:[#allocation9 + $0x28] sm:$0xff]  ;;  %s1240_s15 = scalar_lea.vmem %s1690_s28, 128 }
  0xd5   : > { %v559_v29 = vld [vmem:[#allocation9 + $0x20] sm:$0xff]  ;;  %v562_v35 = vld [vmem:[#allocation9 + $0x38] sm:$0xff]  ;;  %v561_v36 = vld [vmem:[#allocation9 + $0x30] sm:$0xff]  ;;  %p1241_p4 = scmp.ne.s32.totalorder %s1690_s28, %s1240_s15  ;;  %s1347_s11 = smov [#allocation14]  }
  0xd6   : > { %910 = vmatmul.mubr.msk.f32.gmra.mrb[2].mxu0 %vm425_vm0, %v419_v4  ;;  %v585_v44 = vld [vmem:[%s1657_s9] sm:$0xff]  ;;  %s879_s30 = sshll.u32 %s1807_s27, 7  ;;  %s1244_s14 = sshll.u32 %s1347_s11, 4  ;;  %s1245_s14 = int_to_ptr.vmem [resolvable:$false] %s1244_s14 }
  0xd7   : > { %912 = vmatprep.mubr.msk.f32.mxu0 %vm425_vm0, %v420_v5  ;;  %p1810_p9 = scmp.ne.s32.totalorder %s1808_s7, 0  ;;  %s1246_s13 = scalar_lea.vmem %s1245_s14, 256 }
  0xd8   : > { %s1695_s8 = scalar_lea.hbm %s1809_s18, %s879_s30  ;;  %p1247_p0 = scmp.lt.s32.totalorder %s1690_s28, %s1245_s14 }
  0xd9   : > { %p1242_p7 = pnand %p1241_p4, %p1810_p9  ;;  %p1248_p6 = scmp.lt.s32.totalorder %s1246_s13, %s1240_s15 }
  0xda   : > { %913 = vmatmul.mubr.msk.f32.gmra.mrb[4].mxu0 %vm425_vm0, %v421_v6 }
  0xdb   : > { %915 = vmatprep.mubr.msk.f32.mxu0 %vm425_vm0, %v422_v7  ;;  %v596_v43 = vld [vmem:[#allocation2 + $0x50] sm:$0x1]  ;;  %p1243_p2 = pneg %p1242_p7  ;;  %p1249_p3 = por %p1248_p6, %p1247_p0 }
  0xdd   : > { %p1250_p8 = pnand %p1249_p3, %p1243_p2 }
  0xde   : > { %916 = vmatmul.mubr.msk.f32.gmra.mrb[6].mxu0 %vm425_vm0, %v423_v8 }
 0x1a5   : > { %v908_v17 = vpop.f32.mrb[0].mxu0 }
 0x1a6   : > { %v564_v18 = vmul.f32 %v908_v17, %v556_v15  ;;  %v516_v19 = vpop.f32.mrb[1].mxu0 }
 0x1a7   : > { %v563_v20 = vmul.f32 %v555_v16, %v516_v19 }
 0x1a9   : > { %v911_v23 = vpop.f32.mrb[2].mxu0  ;;  %v944_v24 = vpack.c.bf16 %v564_v18, %v563_v20 }
 0x1aa   : > { %v566_v25 = vmul.f32 %v911_v23, %v558_v21  ;;  %v526_v26 = vpop.f32.mrb[3].mxu0 }
 0x1ab   : > { %v565_v27 = vmul.f32 %v557_v22, %v526_v26  ;;  %945 = vmatpush3.bf16.msra.mxu1 %v944_v24 }
 0x1ac   : > { %946 = vmatprep.subr.bf16.mxu1 %v1344_v9 }
 0x1ad   : > { %v914_v30 = vpop.f32.mrb[4].mxu0  ;;  %v947_v31 = vpack.c.bf16 %v566_v25, %v565_v27 }
 0x1ae   : > { %v568_v32 = vmul.f32 %v914_v30, %v560_v28  ;;  %v536_v33 = vpop.f32.mrb[5].mxu0 }
 0x1af   : > { %v567_v34 = vmul.f32 %v559_v29, %v536_v33  ;;  %948 = vmatpush3.bf16.msra.mxu1 %v947_v31 }
 0x1b0   : > { %949 = vmatprep.subr.bf16.mxu1 %v1344_v9 }
 0x1b1   : > { %v917_v37 = vpop.f32.mrb[6].mxu0  ;;  %v950_v38 = vpack.c.bf16 %v568_v32, %v567_v34 }
 0x1b2   : > { %v570_v39 = vmul.f32 %v917_v37, %v562_v35  ;;  %v546_v40 = vpop.f32.mrb[7].mxu0 }
 0x1b3   : > { %v569_v41 = vmul.f32 %v561_v36, %v546_v40  ;;  %951 = vmatpush3.bf16.msra.mxu1 %v950_v38 }
 0x1b4   : > { %952 = vmatprep.subr.bf16.mxu1 %v1344_v9 }
 0x1b5   : > { %v953_v42 = vpack.c.bf16 %v570_v39, %v569_v41 }
 0x1b7   : > { %954 = vmatpush3.bf16.msra.mxu1 %v953_v42 }
 0x1b8   : > { %955 = vmatprep.subr.bf16.mxu1 %v1344_v9 }
 0x1bb   : > { %957 = vmatpush3.bf16.msra.mxu1 %v956_v13 }
 0x1bc   : > { %938 = vmatprep.subr.mxu1 %v1346_v14 }
 0x1bf   : > { %939 = vmatpush3.msk.msra.mxu1 %vm601_vm2, %v596_v43 }
 0x1c0   : > { %941 = vmatmul.mubr.msk.f32.vlgmr.msra.gmra.mrb[0].mxu1 %vm597_vm3, %v585_v44 }
 0x293   : > { %v671_v45 = vpop.f32.mrb[0].mxu1 }
 0x294   : > { %675 = vst [vmem:[%s411_s19] sm:$0xff] %v671_v45  ;;  %v942_v46 = vpop.f32.mrb[1].mxu1 }
 0x295   : > { %1253 = shalt.err (!%p1250_p8)
}
 0x296   : > { %s1254_s12 = scalar_lea.hbm %s1695_s8, 128  ;;  %s1258_s9 = scalar_lea.hbm %s1809_s18, 256 }
 0x297   : > { %p1255_p11 = scmp.ne.s32.totalorder %s1695_s8, %s1254_s12  ;;  %p1259_p5 = scmp.lt.u32.totalorder %s1695_s8, %s1809_s18 }
 0x298   : > { %p1260_p12 = scmp.lt.u32.totalorder %s1258_s9, %s1254_s12  ;;  %p1262_p4 = scmp.lt.u32.totalorder %s1254_s12, %s1695_s8 }
 0x299   : > { %p1256_p10 = pnand %p1255_p11, %p1810_p9 }
 0x29a   : > { %p1261_p1 = por %p1260_p12, %p1259_p5 }
 0x29b   : > { %p1257_p13 = pneg %p1256_p10 }
 0x29c   : > { %p1263_p7 = por %p1262_p4, %p1261_p1 }
 0x29e   : > { %p1264_p2 = pnand %p1263_p7, %p1257_p13 }
 0x2a0   : > { %1267 = shalt.err (!%p1264_p2)
}
 0x2a1   : > { %976 = dma.vmem_to_hbm [thread:$0]  (%p1810_p9), %s1690_s28, 128, %s1695_s8, %s677_s16  }
 0x2a2 PF: > { %s1811_s20 = sld [smem:[#allocation20_spill]]  ;;  %s1812_s6 = sld [smem:[#allocation23_spill]] }
 0x2a3   : > { %p1814_p6 = scmp.ge.s32.totalorder %s1334_s26, 2 }
 0x2a8   : > { %s704_s21 = sand.u32 1, %s1811_s20   ;;  %p1813_p0 = scmp.ne.s32.totalorder %s1812_s6, 0 }
 0x2a9   : > { %s705_s27 = scalar_lea.sflag [#allocation5], %s704_s21 }
 0x2aa   : > { %p999_p3 = pnand %p1814_p6, %p1813_p0 }
 0x2ac   : > { %1309 = dma.done.wait (!%p999_p3), %s705_s27, 128  }
 0x2ad   : > { %1311 = vsyncadd (!%p999_p3), %s705_s27, 4294967168  ;;  %s27_s26 = sadd.s32 1, %s1334_s26   ;;  %s1815_s7 = sld [smem:[#allocation25_spill]] }
 0x2ae   : > { %p24_p8 = scmp.ge.s32.totalorder %s27_s26, 4   ;;  %s1816_s19 = sld [smem:[#allocation24_spill]] }
 0x2af   : > { %s1817_s21 = smov %s1318_s22  ;;  %s1818_s22 = smov %s1322_s23 }
 0x2b0   : > { %s1820_s24 = smov %s1330_s25  ;;  %26 = sbr.rel (!%p24_p8) target bundleno = 14 (0xe), region = 129 }
 0x2b3   : > { %s1819_s23 = smov %s1815_s7 }
 0x2b4   : > { %s1821_s25 = smov %s1816_s19 }
 0x2b7   :  { %710 = vsyncpa [#allocation4], 1 }
 0x2b8   :  { %712 = vsyncpa [#allocation4 + $0x1], 1 }
 0x2b9   :  { %713 = vsyncpa [#allocation7], 1 }
 0x2ba   :  { %715 = vsyncpa [#allocation7 + $0x1], 1 }
 0x2bb   :  { %716 = vsyncpa [#allocation10], 1 }
 0x2bc   :  { %717 = vsyncpa [#allocation13], 1 }
 0x2bd   :  { %718 = vsyncpa [#allocation5], 1 }
 0x2be   :  { %720 = vsyncpa [#allocation5 + $0x1], 1 }

</bundles_post_ra>
